<compile_context>
chip_gen: v7x
topology: tpu7x:2x2x1
jax: 0.10.0
libtpu: 0.0.40
codegen_flags: <defaults>
</compile_context>

<pallas_src>
import functools

import jax
import jax.numpy as jnp
import numpy as np
from jax.experimental import pallas as pl
from jax.experimental.pallas import tpu as pltpu


def _head_kernel(x_ref, w_ref, b_ref, o_ref, acc_ref, *, act):
    # x_ref: (n_tile, C, s_tile)  native dtype, streamed over the S grid axis
    # w_ref: (C, Kp) f32 (1/S pre-folded)    b_ref: (1, Kp) f32
    # o_ref: (n_tile, Kp)                    acc_ref: (n_tile, C) f32 scratch
    s = pl.program_id(1)

    @pl.when(s == 0)
    def _init():
        acc_ref[...] = jnp.zeros_like(acc_ref)

    # Partial spatial-temporal sum for this S tile, accumulated in f32.
    acc_ref[...] += jnp.sum(x_ref[...].astype(jnp.float32), axis=-1)

    @pl.when(s == pl.num_programs(1) - 1)
    def _finalize():
        pooled = acc_ref[...]  # raw sums; the 1/S factor lives in w_ref
        logits = jnp.dot(pooled, w_ref[...], preferred_element_type=jnp.float32)
        logits = logits + b_ref[...]
        if act == "softmax":
            m = jnp.max(logits, axis=-1, keepdims=True)
            e = jnp.exp(logits - m)
            logits = e / jnp.sum(e, axis=-1, keepdims=True)
        elif act == "sigmoid":
            logits = jax.nn.sigmoid(logits)
        o_ref[...] = logits.astype(o_ref.dtype)


def resnet_basic_head(x_ncthw, weight_kc, bias_k, *, training=False,
                      act_func="softmax", n_tile=None, s_tile=None):
    """Fused head: global avg-pool -> linear -> (act if eval) -> (N, K)."""
    N, C, T, H, W = x_ncthw.shape
    K = bias_k.shape[0]
    S = T * H * W

    # (N, C, S) view: collapsing trailing dims is free (no HBM transpose copy).
    x_ncs = x_ncthw.reshape(N, C, S)

    # Pad num_classes to a lane-aligned width and fold 1/S into the weight so
    # the kernel only accumulates raw sums.  Padded bias = -1e30 so softmax
    # assigns exactly 0 probability mass to padding columns.
    Kp = ((K + 127) // 128) * 128
    w_ck = jnp.zeros((C, Kp), jnp.float32)
    w_ck = w_ck.at[:, :K].set(weight_kc.astype(jnp.float32).T * (1.0 / S))
    b_1k = jnp.full((1, Kp), -1e30, jnp.float32)
    b_1k = b_1k.at[0, :K].set(bias_k.astype(jnp.float32))

    # Tile selection:
    #   * n_tile: multiple of 8 (output sublane rule) or the full N.
    #   * s_tile: lane-aligned divisor of S that keeps the double-buffered
    #     input tile within a conservative VMEM budget (fits the 32 MiB scoped
    #     default on v5e/v6e/v7x); falls back to a single full-S step when S
    #     has no 128-multiple divisor.
    if n_tile is None:
        n_tile = 8 if N % 8 == 0 else N
    if s_tile is None:
        itemsize = jnp.dtype(x_ncthw.dtype).itemsize
        budget = 16 * 1024 * 1024
        divisors = [c for c in (2048, 1024, 512, 256, 128) if S % c == 0]
        fitting = [c for c in divisors if 2 * n_tile * C * c * itemsize <= budget]
        if fitting:
            s_tile = fitting[0]
        elif divisors:
            s_tile = divisors[-1]
        else:
            s_tile = S
    assert N % n_tile == 0, "n_tile must divide N"
    assert S % s_tile == 0, "s_tile must divide S"

    grid = (N // n_tile, S // s_tile)
    act = "none" if training else act_func
    kernel = functools.partial(_head_kernel, act=act)

    out = pl.pallas_call(
        kernel,
        out_shape=jax.ShapeDtypeStruct((N, Kp), jnp.float32),
        grid=grid,
        in_specs=[
            pl.BlockSpec((n_tile, C, s_tile), lambda i, s: (i, 0, s)),
            pl.BlockSpec((C, Kp), lambda i, s: (0, 0)),
            pl.BlockSpec((1, Kp), lambda i, s: (0, 0)),
        ],
        out_specs=pl.BlockSpec((n_tile, Kp), lambda i, s: (i, 0)),
        scratch_shapes=[pltpu.VMEM((n_tile, C), jnp.float32)],
        compiler_params=pltpu.CompilerParams(
            dimension_semantics=("parallel", "arbitrary"),
        ),
    )(x_ncs, w_ck, b_1k)

    return out[:, :K]


# TODO(synk): pool_size != None (AvgPool3d(pool_size, stride=1) followed by the
# test-time .mean([1,2,3]) branch) is not implemented; only the pool_size=None
# (adaptive 1x1x1 pool) configuration is covered here.


if __name__ == "__main__":
    # Small shapes consistent with a 3D head input (N, C, T, H, W); S = 256.
    N, C, T, H, W = 16, 4, 2, 16, 8
    num_classes = 10

    key = jax.random.PRNGKey(0)
    kx, kw, kb = jax.random.split(key, 3)

    x = jax.random.normal(kx, (N, C, T, H, W), dtype=jnp.float32)

    # Deterministic nn.Linear-style init: U(-1/sqrt(C), 1/sqrt(C)).
    bound = 1.0 / np.sqrt(C)
    weight = jax.random.uniform(kw, (num_classes, C), jnp.float32, -bound, bound)
    bias = jax.random.uniform(kb, (num_classes,), jnp.float32, -bound, bound)

    # Force a 2x2 grid (N tiled on the parallel axis, S streamed over the
    # arbitrary reduction axis) so accumulate/finalize paths are exercised.
    out = resnet_basic_head(x, weight, bias, training=False, n_tile=8, s_tile=128)
    out = jax.block_until_ready(out)

    # Pure-JAX reference of the same forward pass (eval mode).
    pooled_ref = x.mean(axis=(2, 3, 4))                 # (N, C)
    logits_ref = pooled_ref @ weight.T + bias           # (N, K)
    ref = jax.nn.softmax(logits_ref, axis=-1)

    assert out.shape == (N, num_classes)
    np.testing.assert_allclose(np.asarray(out), np.asarray(ref), rtol=1e-5, atol=1e-5)

    print("KERNEL_OK")
</pallas_src>

<mosaic_0001>
module attributes {stable_mosaic.version = 11 : i64} {
  func.func @_head_kernel(%arg0: i32, %arg1: i32, %arg2: memref<8x4x128xf32, #tpu.memory_space<vmem>>, %arg3: memref<4x128xf32, #tpu.memory_space<vmem>>, %arg4: memref<1x128xf32, #tpu.memory_space<vmem>>, %arg5: memref<8x128xf32, #tpu.memory_space<vmem>>, %arg6: memref<8x4xf32, #tpu.memory_space<vmem>>) attributes {dimension_semantics = [#tpu.dimension_semantics<parallel>, #tpu.dimension_semantics<arbitrary>], iteration_bounds = array<i64: 2, 2>, scalar_prefetch = 0 : i64, scratch_operands = 1 : i64, tpu.core_type = #tpu.core_type<tc>, window_params = [{transform_indices = @transform_0, window_bounds = array<i64: 8, 4, 128>}, {pipeline_mode = #tpu.pipeline_mode<synchronous>, transform_indices = @transform_1, window_bounds = array<i64: 4, 128>}, {pipeline_mode = #tpu.pipeline_mode<synchronous>, transform_indices = @transform_2, window_bounds = array<i64: 1, 128>}, {transform_indices = @transform_3, window_bounds = array<i64: 8, 128>}]} {
    %c0_i32 = arith.constant 0 : i32
    %0 = arith.cmpi eq, %arg1, %c0_i32 : i32
    %1 = arith.extui %0 : i1 to i32
    %c0_i32_0 = arith.constant 0 : i32
    %2 = arith.cmpi ne, %1, %c0_i32_0 : i32
    scf.if %2 {
      %cst_8 = arith.constant 0.000000e+00 : f32
      %11 = vector.broadcast %cst_8 : f32 to vector<8x4xf32>
      %c0_9 = arith.constant 0 : index
      %c0_10 = arith.constant 0 : index
      %12 = vector.load %arg6[%c0_9, %c0_10] : memref<8x4xf32, #tpu.memory_space<vmem>>, vector<8x4xf32>
      tpu.vector_store %arg6[%c0_9, %c0_10], %11 {strides = array<i32>} : memref<8x4xf32, #tpu.memory_space<vmem>>, vector<8x4xf32>,
    } else {
    }
    %c0 = arith.constant 0 : index
    %c0_1 = arith.constant 0 : index
    %3 = vector.load %arg6[%c0, %c0_1] : memref<8x4xf32, #tpu.memory_space<vmem>>, vector<8x4xf32>
    %c0_2 = arith.constant 0 : index
    %c0_3 = arith.constant 0 : index
    %c0_4 = arith.constant 0 : index
    %4 = vector.load %arg2[%c0_2, %c0_3, %c0_4] : memref<8x4x128xf32, #tpu.memory_space<vmem>>, vector<8x4x128xf32>
    %cst = arith.constant dense<0.000000e+00> : vector<8x4xf32>
    %5 = vector.multi_reduction <add>, %4, %cst [2] : vector<8x4x128xf32> to vector<8x4xf32>
    %6 = arith.addf %3, %5 : vector<8x4xf32>
    %c0_5 = arith.constant 0 : index
    %c0_6 = arith.constant 0 : index
    %7 = vector.load %arg6[%c0_5, %c0_6] : memref<8x4xf32, #tpu.memory_space<vmem>>, vector<8x4xf32>
    tpu.vector_store %arg6[%c0_5, %c0_6], %6 {strides = array<i32>} : memref<8x4xf32, #tpu.memory_space<vmem>>, vector<8x4xf32>,
    %c1_i32 = arith.constant 1 : i32
    %8 = arith.cmpi eq, %arg1, %c1_i32 : i32
    %9 = arith.extui %8 : i1 to i32
    %c0_i32_7 = arith.constant 0 : i32
    %10 = arith.cmpi ne, %9, %c0_i32_7 : i32
    scf.if %10 {
      %c0_8 = arith.constant 0 : index
      %c0_9 = arith.constant 0 : index
      %11 = vector.load %arg6[%c0_8, %c0_9] : memref<8x4xf32, #tpu.memory_space<vmem>>, vector<8x4xf32>
      %c0_10 = arith.constant 0 : index
      %c0_11 = arith.constant 0 : index
      %12 = vector.load %arg3[%c0_10, %c0_11] : memref<4x128xf32, #tpu.memory_space<vmem>>, vector<4x128xf32>
      %cst_12 = arith.constant dense<0.000000e+00> : vector<8x128xf32>
      %13 = tpu.matmul %11, %12, %cst_12 {dimension_numbers = #tpu.dot_dimension_numbers<[1], [0], [0], [1], [0, 0, 1, 1], [], []>} : vector<8x4xf32>, vector<4x128xf32>, vector<8x128xf32> -> vector<8x128xf32>
      %c0_13 = arith.constant 0 : index
      %c0_14 = arith.constant 0 : index
      %14 = vector.load %arg4[%c0_13, %c0_14] : memref<1x128xf32, #tpu.memory_space<vmem>>, vector<1x128xf32>
      %15 = vector.broadcast %14 : vector<1x128xf32> to vector<8x128xf32>
      %16 = arith.addf %13, %15 : vector<8x128xf32>
      %cst_15 = arith.constant dense<0xFF800000> : vector<8xf32>
      %17 = vector.multi_reduction <maximumf>, %16, %cst_15 [1] : vector<8x128xf32> to vector<8xf32>
      %18 = vector.shape_cast %17 : vector<8xf32> to vector<8x1xf32>
      %19 = vector.broadcast %18 : vector<8x1xf32> to vector<8x128xf32>
      %20 = arith.subf %16, %19 : vector<8x128xf32>
      %21 = math.exp %20 : vector<8x128xf32>
      %cst_16 = arith.constant dense<0.000000e+00> : vector<8xf32>
      %22 = vector.multi_reduction <add>, %21, %cst_16 [1] : vector<8x128xf32> to vector<8xf32>
      %23 = vector.shape_cast %22 : vector<8xf32> to vector<8x1xf32>
      %24 = vector.broadcast %23 : vector<8x1xf32> to vector<8x128xf32>
      %25 = arith.divf %21, %24 : vector<8x128xf32>
      %c0_17 = arith.constant 0 : index
      %c0_18 = arith.constant 0 : index
      %26 = vector.load %arg5[%c0_17, %c0_18] : memref<8x128xf32, #tpu.memory_space<vmem>>, vector<8x128xf32>
      tpu.vector_store %arg5[%c0_17, %c0_18], %25 {strides = array<i32>} : memref<8x128xf32, #tpu.memory_space<vmem>>, vector<8x128xf32>,
    } else {
    }
    return
  }
  func.func @transform_0(%arg0: i32, %arg1: i32) -> (i32, i32, i32) {
    %c0_i32 = arith.constant 0 : i32
    %c0_i32_0 = arith.constant 0 : i32
    return %arg0, %c0_i32, %arg1 : i32, i32, i32
  }
  func.func @transform_1(%arg0: i32, %arg1: i32) -> (i32, i32) {
    %c0_i32 = arith.constant 0 : i32
    %c0_i32_0 = arith.constant 0 : i32
    %c0_i32_1 = arith.constant 0 : i32
    return %c0_i32, %c0_i32_0 : i32, i32
  }
  func.func @transform_2(%arg0: i32, %arg1: i32) -> (i32, i32) {
    %c0_i32 = arith.constant 0 : i32
    %c0_i32_0 = arith.constant 0 : i32
    %c0_i32_1 = arith.constant 0 : i32
    return %c0_i32, %c0_i32_0 : i32, i32
  }
  func.func @transform_3(%arg0: i32, %arg1: i32) -> (i32, i32) {
    %c0_i32 = arith.constant 0 : i32
    %c0_i32_0 = arith.constant 0 : i32
    return %arg0, %c0_i32 : i32, i32
  }
}

</mosaic_0001>

<bundles_post_ra>
// kernel: tpu_custom_call.1
= control target key start
LH: loop header
LB: loop body
LE: loop exit
PB: predicated region body
PF: predicated region fallthrough
CT: control target
= control target key end

     0   :  { %s1183_s0 = inlined_call_operand.hbm [shape: f32[16,4,256], index: 0, kind: input, shape index: {}]   ;;  %s1184_s1 = inlined_call_operand.hbm [shape: f32[4,128], index: 1, kind: input, shape index: {}]   ;;  %s1185_s2 = inlined_call_operand.vmem [shape: f32[1,128], index: 2, kind: input, shape index: {}]   ;;  %s1186_s3 = inlined_call_operand.hbm [shape: f32[16,128], index: 3, kind: output, shape index: {}]  }
   0x1   :  { %1198 = sst [smem:[#allocation17_spill]] %s1184_s1 }
   0x2   :  { %8 = vsyncpa [#allocation4], 0 }
   0x3   :  { %10 = vsyncpa [#allocation4 + $0x1], 0 }
   0x4   :  { %11 = vsyncpa [#allocation7], 0 }
   0x5   :  { %12 = vsyncpa [#allocation5], 0 }
   0x6   :  { %14 = vsyncpa [#allocation5 + $0x1], 0  ;;  %s893_s12 = smov 0   ;;  %s895_s13 = smov 0  }
   0x7   :  { %s897_s14 = smov 0   ;;  %s899_s15 = smov 0  }
   0x8   :  { %s901_s16 = smov 0   ;;  %s903_s17 = smov 0  }
   0x9   :  { %s905_s18 = smov 0   ;;  %s907_s19 = smov 0  }
   0xa   :  { %s909_s20 = smov 0   ;;  %s911_s21 = smov 0  }
   0xb   :  { %s913_s22 = smov 0  }
   0xc LB: > { %1199 = sst [smem:[#allocation12_spill]] %s822_s12  ;;  %s525_s23 = sadd.s32 4294967295, %s862_s22   ;;  %s862_s22 = sphi %s913_s22, %s20_s22   ;;  %s858_s21 = sphi %s911_s21, %s1233_s21   ;;  %s854_s20 = sphi %s909_s20, %s1224_s20   ;;  %s850_s19 = sphi %s907_s19, %s1232_s19   ;;  %s846_s18 = sphi %s905_s18, %s1223_s18   ;;  %s842_s17 = sphi %s903_s17, %s1231_s17   ;;  %s838_s16 = sphi %s901_s16, %s1230_s16   ;;  %s834_s15 = sphi %s899_s15, %s1229_s15   ;;  %s830_s14 = sphi %s897_s14, %s1228_s14   ;;  %s826_s13 = sphi %s895_s13, %s1227_s13   ;;  %s822_s12 = sphi %s893_s12, %s1226_s12  }
   0xd   : > { %1200 = sst [smem:[#allocation13_spill]] %s854_s20  ;;  %s526_s24 = sadd.s32 4294967294, %s862_s22  }
   0xe   : > { %p48_p0 = scmp.ne.s32.totalorder %s842_s17, %s838_s16  ;;  %p49_p1 = scmp.eq.s32.totalorder %s862_s22, 0 }
   0xf   : > { %p54_p2 = scmp.ne.s32.totalorder %s838_s16, %s834_s15  ;;  %p953_p3 = scmp.eq.s32.totalorder %s525_s23, 0 }
  0x10   : > { %p958_p4 = por %p49_p1, %p48_p0  ;;  %p119_p5 = scmp.ne.s32.totalorder %s830_s14, %s826_s13 }
  0x11   : > { %s1201_s26 = scalar_select %p953_p3, 1, 0 }
  0x12   : > { %p966_p6 = por %p953_p3, %p54_p2  ;;  %p120_p7 = scmp.eq.s32.totalorder %s525_s23, 3 }
  0x13   : > { %p125_p8 = scmp.ne.s32.totalorder %s826_s13, %s822_s12  ;;  %p126_p9 = scmp.eq.s32.totalorder %s526_s24, 3 }
  0x14   : > { %s1203_s29 = scalar_select %p966_p6, 1, 0 }
  0x15   : > { %p972_p10 = por %p120_p7, %p119_p5  ;;  %p527_p11 = scmp.ge.s32.totalorder %s862_s22, 1 }
  0x16   : > { %p977_p12 = por %p126_p9, %p125_p8  ;;  %p133_p13 = scmp.lt.s32.totalorder %s862_s22, 5 }
  0x17   : > { %s1204_s30 = scalar_select %p972_p10, 1, 0 }
  0x18   : > { %s1205_s4 = scalar_select %p977_p12, 1, 0 }
  0x19   : > { %p982_p0 = pnand %p527_p11, %p133_p13  ;;  %s864_s6 = smov [#allocation6]  }
  0x1a   : > { %1206 = sst [smem:[#allocation14_spill]] %s1205_s4  ;;  %s146_s7 = sshll.u32 %s864_s6, 4  ;;  %s147_s7 = int_to_ptr.vmem [resolvable:$true] %s146_s7 }
  0x1b   : > { %s1207_s5 = scalar_select %p982_p0, 1, 0 }
  0x1c   : > { %p563_p1 = pneg %p982_p0  ;;  %p576_p2 = scmp.lt.s32.totalorder %s862_s22, 4 }
  0x1d   : > { %s1210_s1 = sld [smem:[#allocation17_spill]] }
  0x1e   : > { %p991_p5 = pnand %p563_p1, %p953_p3  ;;  %p997_p7 = pnand %p576_p2, %p958_p4 }
  0x20   : > { %s1209_s9 = scalar_select %p997_p7, 1, 0 }
  0x21   : > { %p680_p9 = pneg %p991_p5 }
  0x23   : > { %s678_s15 = scalar_lea.hbm %s1210_s1, 64 }
  0x24   : > { %p679_p8 = scmp.ne.s32.totalorder %s1210_s1, %s678_s15  ;;  %p685_p1 = scmp.lt.u32.totalorder %s678_s15, %s1210_s1 }
  0x26   : > { %p681_p11 = pnand %p680_p9, %p679_p8 }
  0x28   : > { %p682_p13 = pneg %p681_p11 }
  0x2a   : > { %p687_p4 = pnand %p685_p1, %p682_p13 }
  0x2c   : > { %690 = shalt.err (!%p687_p4)
}
  0x2d   : > { %s691_s28 = scalar_lea.vmem %s147_s7, 64  ;;  %p699_p3 = scmp.lt.s32.totalorder %s147_s7, %s147_s7 }
  0x2e   : > { %p692_p2 = scmp.ne.s32.totalorder %s147_s7, %s691_s28  ;;  %p700_p6 = scmp.lt.s32.totalorder %s691_s28, %s691_s28 }
  0x30   : > { %p694_p12 = pnand %p692_p2, %p680_p9  ;;  %p701_p0 = por %p700_p6, %p699_p3 }
  0x32   : > { %p695_p10 = pneg %p694_p12 }
  0x34   : > { %p702_p7 = pnand %p701_p0, %p695_p10 }
  0x36   : > { %705 = shalt.err (!%p702_p7)
}
  0x37   : > { %566 = dma.hbm_to_vmem [thread:$0]  (!%p991_p5), %s1210_s1, 64, %s147_s7, [#allocation7]  }
  0x38   : > { %s29_s25 = sadd.s32 1, %s854_s20  ;;  %s32_s15 = sadd.s32 1, %s858_s21 }
  0x39   : > { %p30_p12 = scmp.ge.s32.totalorder %s29_s25, 2  ;;  %s160_s23 = sand.u32 1, %s842_s17  }
  0x3a   : > { %s530_s24 = sshll.u32 %s160_s23, 5  ;;  %s547_s6 = sshll.u32 %s858_s21, 4 }
  0x3b   : > { %s1235_s25 = smov (%p30_p12, %s29_s25), 0  ;;  %s1237_s15 = smov (!%p30_p12, %s32_s15), %s858_s21 }
  0x3c   : > { %1211 = sst [smem:[#allocation15_spill]] %s1235_s25  ;;  %s37_s8 = ssub.s32 %s854_s20, %s1235_s25 }
  0x3d   : > { %p34_p3 = scmp.ge.s32.totalorder %s1237_s15, 2  ;;  %s170_s28 = sadd.s32 %s854_s20, %s547_s6 }
  0x3e   : > { %s164_s7 = scalar_lea.vmem [#allocation3], %s530_s24  ;;  %s533_s11 = sshll.u32 %s170_s28, 6 }
  0x3f   : > { %s173_s10 = sshll.u32 %s164_s7, 4  ;;  %s1239_s15 = smov (%p34_p3, %s1237_s15), 0  ;;  %s1029_s10 = int_to_ptr.vmem [resolvable:$true] %s173_s10 }
  0x40   : > { %1212 = sst [smem:[#allocation16_spill]] %s1239_s15  ;;  %s36_s27 = ssub.s32 %s858_s21, %s1239_s15 }
  0x41   : > { %s1036_s12 = scalar_lea.hbm %s1183_s0, %s533_s11  ;;  %s38_s6 = sor.u32 %s37_s8, %s36_s27 }
  0x42   : > { %p107_p6 = scmp.eq.s32.totalorder %s36_s27, 0  ;;  %p39_p10 = scmp.eq.s32.totalorder %s38_s6, 0 }
  0x43   : > { %s1213_s24 = sadd.s32 1, %s830_s14  ;;  %s1214_s25 = sadd.s32 1, %s842_s17 }
  0x44   : > { %s1041_s7 = scalar_select %p107_p6, %s830_s14, %s1213_s24  }
  0x45   : > { %s1046_s28 = scalar_select %p39_p10, %s842_s17, %s1214_s25  }
  0x46   : > { %s1048_s20 = scalar_lea.sflag [#allocation4], %s160_s23  ;;  %s706_s15 = scalar_lea.hbm %s1036_s12, 512 }
  0x47   : > { %p707_p0 = scmp.ne.s32.totalorder %s1036_s12, %s706_s15  ;;  %p1215_p5 = scmp.ne.s32.totalorder %s1209_s9, 0 }
  0x48   : > { %s711_s27 = scalar_lea.hbm %s1183_s0, 2048  ;;  %p712_p11 = scmp.lt.u32.totalorder %s1036_s12, %s1183_s0 }
  0x49   : > { %p708_p7 = pneg %p1215_p5  ;;  %p713_p13 = scmp.lt.u32.totalorder %s711_s27, %s706_s15 }
  0x4a   : > { %p715_p4 = scmp.lt.u32.totalorder %s706_s15, %s1036_s12 }
  0x4b   : > { %p709_p8 = pnand %p708_p7, %p707_p0  ;;  %p714_p1 = por %p713_p13, %p712_p11 }
  0x4d   : > { %p710_p9 = pneg %p709_p8  ;;  %p716_p2 = por %p715_p4, %p714_p1 }
  0x4f   : > { %p717_p12 = pnand %p716_p2, %p710_p9 }
  0x51   : > { %720 = shalt.err (!%p717_p12)
}
  0x52   : > { %s721_s25 = scalar_lea.vmem %s1029_s10, 512  ;;  %s865_s23 = smov [#allocation3]  }
  0x53   : > { %p722_p3 = scmp.ne.s32.totalorder %s1029_s10, %s721_s25  ;;  %s726_s6 = sshll.u32 %s865_s23, 4  ;;  %s727_s6 = int_to_ptr.vmem [resolvable:$false] %s726_s6 }
  0x54   : > { %s728_s24 = scalar_lea.vmem %s727_s6, 1024  ;;  %p729_p0 = scmp.lt.s32.totalorder %s1029_s10, %s727_s6 }
  0x55   : > { %p724_p6 = pnand %p722_p3, %p708_p7  ;;  %p730_p8 = scmp.lt.s32.totalorder %s728_s24, %s721_s25 }
  0x57   : > { %p725_p10 = pneg %p724_p6  ;;  %p731_p11 = por %p730_p8, %p729_p0 }
  0x59   : > { %p732_p13 = pnand %p731_p11, %p725_p10 }
  0x5b   : > { %735 = shalt.err (!%p732_p13)
}
  0x5c   : > { %s866_s15 = smov 128   ;;  %s867_s1 = smov 64  }
  0x5d   : > { %s868_s4 = smov 4   ;;  %p1216_p7 = scmp.ne.s32.totalorder %s1207_s5, 0 }
  0x5e   : > { %570 = dma.hbm_to_vmem [thread:$0]  (!%p1215_p5), %s1036_s12, 512, %s1029_s10, %s1048_s20, %s866_s15, %s867_s1, %s868_s4  }
  0x5f   : > { %185 = sbr.rel (%p1216_p7) target bundleno = 837 (0x345), region = 32  ;;  %s187_s27 = sand.u32 (!%p1216_p7), 1, %s838_s16  }
  0x60   : > { %s535_s8 = sshll.u32 (!%p1216_p7), %s187_s27, 5  ;;  %s188_s11 = scalar_lea.sflag (!%p1216_p7), [#allocation4], %s187_s27 }
  0x61   : > { %s1079_s25 = scalar_lea.vmem (!%p1216_p7), [#allocation3], %s535_s8  ;;  %p1217_p9 = scmp.ne.s32.totalorder (!%p1216_p7), %s1203_s29, 0 }
  0x66   : > { %809 = dma.done.wait (%p1217_p9), %s188_s11, 512  }
  0x67   : > { %811 = vsyncadd (%p1217_p9), %s188_s11, 4294966784  ;;  %p1218_p1 = scmp.ne.s32.totalorder %s1201_s26, 0 }
  0x69   : > { %813 = dma.done.wait (%p1218_p1), [#allocation7], 64  }
  0x6a   : > { %815 = vsyncadd (%p1218_p1), [#allocation7], 4294967232  ;;  %s215_s12 = sand.u32 1, %s826_s13   ;;  %p538_p5 = scmp.ne.s32.totalorder %s846_s18, 0 }
  0x6b   : > { %s1092_s20 = sshll.u32 %s215_s12, 3  ;;  %vm223_vm0 = vcmask (!%p538_p5), 31744   ;;  %v869_v0 = vmov (!%p538_p5), 0.0  }
  0x6c   : > { %s217_s5 = scalar_lea.vmem [#allocation8], %s1092_s20  ;;  %222 = sbr.rel (%p538_p5) target bundleno = 115 (0x73), region = 44  ;;  %224 = vst.msk [vmem:[#allocation2] sm:$0xff] (!%p538_p5), %vm223_vm0, %v869_v0 }
  0x73 PF: > { %v226_v1 = vld [vmem:[%s1079_s25] sm:$0xf]  ;;  %vm234_vm1 = vcmask 1043456   ;;  %v228_v2 = vld [vmem:[%s1079_s25 + $0x8] sm:$0xf]  ;;  %v267_v17 = vlaneseq  ;;  %vm301_vm2 = vcmask 1041409  }
  0x74   : > { %v235_v3 = vsel %vm234_vm1, %v226_v1, 0.0  ;;  %v241_v4 = vsel %vm234_vm1, %v228_v2, 0.0  ;;  %v227_v5 = vld [vmem:[%s1079_s25 + $0x4] sm:$0xf]  ;;  %v229_v6 = vld [vmem:[%s1079_s25 + $0xc] sm:$0xf] }
  0x75   : > { %236 = vadd.xlane.f32.xlu0 %v235_v3  ;;  %242 = vadd.xlane.f32.xlu1 %v241_v4  ;;  %v238_v7 = vsel %vm234_vm1, %v227_v5, 0.0  ;;  %v244_v8 = vsel %vm234_vm1, %v229_v6, 0.0  ;;  %v230_v9 = vld [vmem:[%s1079_s25 + $0x10] sm:$0xf]  ;;  %v231_v10 = vld [vmem:[%s1079_s25 + $0x14] sm:$0xf] }
  0x76   : > { %v247_v11 = vsel %vm234_vm1, %v230_v9, 0.0  ;;  %v250_v12 = vsel %vm234_vm1, %v231_v10, 0.0  ;;  %v232_v13 = vld [vmem:[%s1079_s25 + $0x18] sm:$0xf]  ;;  %v233_v14 = vld [vmem:[%s1079_s25 + $0x1c] sm:$0xf] }
  0x77   : > { %v253_v15 = vsel %vm234_vm1, %v232_v13, 0.0  ;;  %v256_v16 = vsel %vm234_vm1, %v233_v14, 0.0  ;;  %v268_v18 = vand.u32 127, %v267_v17  ;;  %v270_v19 = vshrl.u32 %v267_v17, 7  ;;  %v225_v42 = vld [vmem:[#allocation2] sm:$0xff]  ;;  %p539_p4 = scmp.ne.s32.totalorder %s846_s18, 1 }
  0x78   : > { %vm303_vm3 = vcmask 1042434   ;;  %vm305_vm4 = vcmask 1043459   ;;  %vm307_vm5 = vcmask 1044484   ;;  %vm309_vm6 = vcmask 1045509   ;;  %v324_v46 = vld [vmem:[#allocation6] sm:$0xf] (!%p539_p4) }
  0x79   : > { %239 = vadd.xlane.f32.xlu0 %v238_v7  ;;  %245 = vadd.xlane.f32.xlu1 %v244_v8  ;;  %v271_v22 = vsub.s32 %v268_v18, %v270_v19  ;;  %vm311_vm7 = vcmask 1046534   ;;  %vm313_vm8 = vcmask 1047559   ;;  %vm317_vm9 = vcmask 31744   ;;  %v540_v49 = vld [vmem:[%s1185_s2] ss:$0 sm:$0xff] (!%p539_p4) }
  0x7a   : > { %v870_v48 = vmov (!%p539_p4), 0.0   ;;  %vm871_vm10 = vmmov (!%p539_p4), 0  }
  0x7b   : > { %550 = vmatprep.subr.mxu0 (!%p539_p4), %v870_v48  ;;  %552 = vmatprep.mubr.msk.f32.mxu0 (!%p539_p4), %vm871_vm10, %v870_v48 }
  0x7c   : > { %551 = vmatpush3.msk.msra.mxu0 (!%p539_p4), %vm234_vm1, %v324_v46 }
  0x7d   : > { %248 = vadd.xlane.f32.xlu0 %v247_v11  ;;  %251 = vadd.xlane.f32.xlu1 %v250_v12 }
  0x81   : > { %254 = vadd.xlane.f32.xlu0 %v253_v15  ;;  %257 = vadd.xlane.f32.xlu1 %v256_v16 }
 0x102   : > { %v237_v20 = vpop.xlane.xlu0 %236  ;;  %v243_v21 = vpop.xlane.xlu1 %242 }
 0x103   : > { %v272_v25 = vrot.slane %v237_v20, %v271_v22  ;;  %v280_v28 = vrot.slane %v243_v21, %v271_v22 }
 0x106   : > { %v240_v23 = vpop.xlane.xlu0 %239  ;;  %v246_v24 = vpop.xlane.xlu1 %245 }
 0x107   : > { %v276_v26 = vrot.slane %v240_v23, %v271_v22  ;;  %v284_v27 = vrot.slane %v246_v24, %v271_v22 }
 0x109   : > { %v302_v29 = vsel %vm301_vm2, %v276_v26, %v272_v25 }
 0x10a   : > { %v304_v30 = vsel %vm303_vm3, %v280_v28, %v302_v29  ;;  %v249_v31 = vpop.xlane.xlu0 %248  ;;  %v252_v32 = vpop.xlane.xlu1 %251 }
 0x10b   : > { %v306_v33 = vsel %vm305_vm4, %v284_v27, %v304_v30  ;;  %v288_v34 = vrot.slane %v249_v31, %v271_v22  ;;  %v292_v35 = vrot.slane %v252_v32, %v271_v22 }
 0x10d   : > { %v308_v36 = vsel %vm307_vm5, %v288_v34, %v306_v33 }
 0x10e   : > { %v255_v37 = vpop.xlane.xlu0 %254  ;;  %v258_v38 = vpop.xlane.xlu1 %257  ;;  %v310_v41 = vsel %vm309_vm6, %v292_v35, %v308_v36 }
 0x10f   : > { %v296_v39 = vrot.slane %v255_v37, %v271_v22  ;;  %v300_v40 = vrot.slane %v258_v38, %v271_v22  ;;  %322 = sbr.rel (%p539_p4) target bundleno = 812 (0x32c), region = 48 }
 0x111   : > { %v312_v43 = vsel %vm311_vm7, %v296_v39, %v310_v41 }
 0x112   : > { %v314_v44 = vsel %vm313_vm8, %v300_v40, %v312_v43 }
 0x113   : > { %v316_v45 = vadd.f32 %v314_v44, %v225_v42 }
 0x115   : > { %318 = vst.msk [vmem:[#allocation2] sm:$0xff] %vm317_vm9, %v316_v45 }
 0x11c   : > { %v323_v47 = vld [vmem:[#allocation2] sm:$0xff] }
 0x11d   : > { %553 = vmatmul.mubr.msk.f32.vlgmr.msra.gmra.mrb[0].mxu0 %vm317_vm9, %v323_v47 }
 0x1f0   : > { %v404_v50 = vpop.f32.mrb[0].mxu0 }
 0x1f1   : > { %v405_v51 = vadd.f32 %v540_v49, %v404_v50  ;;  %v554_v52 = vpop.f32.mrb[1].mxu0 }
 0x1f3   : > { %408 = vmax.xlane.f32.xlu0 %v405_v51 }
 0x280   : > { %v409_v53 = vpop.xlane.xlu0 %408 }
 0x281   : > { %v410_v54 = vsub.f32 %v405_v51, %v409_v53 }
 0x283   : > { %v411_v55 = vmul.f32 1.442695, %v410_v54 }
 0x285   : > { %674 = vpow2.f32 %v411_v55 }
 0x28f   : > { %v675_v56 = vpop.eup %674 }
 0x290   : > { %413 = vadd.xlane.f32.xlu0 %v675_v56 }
 0x31d   : > { %v414_v57 = vpop.xlane.xlu0 %413 }
 0x31e   : > { %676 = vrcp.f32 %v414_v57 }
 0x328   : > { %v677_v58 = vpop.eup %676 }
 0x329   : > { %v416_v59 = vmul.f32 %v677_v58, %v675_v56 }
 0x32b   : > { %417 = vst [vmem:[%s217_s5] sm:$0xff] %v416_v59 }
 0x32c PF: > { %s544_s18 = sshll.u32 %s850_s19, 7  ;;  %s432_s6 = sshll.u32 %s217_s5, 4  ;;  %s433_s6 = int_to_ptr.vmem [resolvable:$true] %s432_s6 }
 0x32d   : > { %s1123_s23 = scalar_lea.hbm %s1186_s3, %s544_s18  ;;  %s419_s24 = scalar_lea.sflag [#allocation5], %s215_s12 }
 0x32e   : > { %s736_s15 = scalar_lea.vmem %s433_s6, 128  ;;  %p1219_p12 = scmp.ne.s32.totalorder %s1204_s30, 0 }
 0x32f   : > { %p737_p2 = scmp.ne.s32.totalorder %s433_s6, %s736_s15  ;;  %s872_s1 = smov [#allocation8]  }
 0x330   : > { %s740_s4 = sshll.u32 %s872_s1, 4  ;;  %s741_s4 = int_to_ptr.vmem [resolvable:$false] %s740_s4 }
 0x331   : > { %p738_p3 = pnand %p737_p2, %p1219_p12  ;;  %s742_s27 = scalar_lea.vmem %s741_s4, 256 }
 0x332   : > { %p743_p10 = scmp.lt.s32.totalorder %s433_s6, %s741_s4  ;;  %p744_p0 = scmp.lt.s32.totalorder %s742_s27, %s736_s15 }
 0x333   : > { %p739_p6 = pneg %p738_p3 }
 0x334   : > { %p745_p8 = por %p744_p0, %p743_p10 }
 0x336   : > { %p746_p11 = pnand %p745_p8, %p739_p6 }
 0x338   : > { %749 = shalt.err (!%p746_p11)
}
 0x339   : > { %s750_s19 = scalar_lea.hbm %s1123_s23, 128  ;;  %s754_s25 = scalar_lea.hbm %s1186_s3, 256 }
 0x33a   : > { %p751_p13 = scmp.ne.s32.totalorder %s1123_s23, %s750_s19  ;;  %p755_p1 = scmp.lt.u32.totalorder %s1123_s23, %s1186_s3 }
 0x33b   : > { %p756_p5 = scmp.lt.u32.totalorder %s754_s25, %s750_s19  ;;  %p758_p2 = scmp.lt.u32.totalorder %s750_s19, %s1123_s23 }
 0x33c   : > { %p752_p7 = pnand %p751_p13, %p1219_p12 }
 0x33d   : > { %p757_p4 = por %p756_p5, %p755_p1 }
 0x33e   : > { %p753_p9 = pneg %p752_p7 }
 0x33f   : > { %p759_p3 = por %p758_p2, %p757_p4 }
 0x341   : > { %p760_p6 = pnand %p759_p3, %p753_p9 }
 0x343   : > { %763 = shalt.err (!%p760_p6)
}
 0x344   : > { %561 = dma.vmem_to_hbm [thread:$0]  (%p1219_p12), %s433_s6, 128, %s1123_s23, %s419_s24  }
 0x345 PF: > { %s1220_s5 = sld [smem:[#allocation12_spill]]  ;;  %s1221_s26 = sld [smem:[#allocation14_spill]] }
 0x346   : > { %p578_p10 = scmp.ge.s32.totalorder %s862_s22, 2 }
 0x34b   : > { %s444_s29 = sand.u32 1, %s1220_s5   ;;  %p1222_p0 = scmp.ne.s32.totalorder %s1221_s26, 0 }
 0x34c   : > { %s445_s18 = scalar_lea.sflag [#allocation5], %s444_s29 }
 0x34d   : > { %p572_p8 = pnand %p578_p10, %p1222_p0 }
 0x34f   : > { %817 = dma.done.wait (!%p572_p8), %s445_s18, 128  }
 0x350   : > { %819 = vsyncadd (!%p572_p8), %s445_s18, 4294967168  ;;  %s20_s22 = sadd.s32 1, %s862_s22   ;;  %s1223_s18 = sld [smem:[#allocation13_spill]] }
 0x351   : > { %p17_p11 = scmp.ge.s32.totalorder %s20_s22, 6   ;;  %s1224_s20 = sld [smem:[#allocation15_spill]] }
 0x352   : > { %s1225_s30 = sld [smem:[#allocation16_spill]]  ;;  %s1226_s12 = smov %s826_s13 }
 0x353   : > { %s1227_s13 = smov %s830_s14  ;;  %s1228_s14 = smov %s1041_s7 }
 0x354   : > { %s1229_s15 = smov %s838_s16  ;;  %s1230_s16 = smov %s842_s17 }
 0x355   : > { %s1231_s17 = smov %s1046_s28  ;;  %s1232_s19 = smov %s858_s21 }
 0x356   :  { %19 = sbr.rel (!%p17_p11) target bundleno = 12 (0xc), region = 89 }
 0x358   : > { %s1233_s21 = smov %s1225_s30 }
 0x35d   :  { %450 = vsyncpa [#allocation4], 1 }
 0x35e   :  { %452 = vsyncpa [#allocation4 + $0x1], 1 }
 0x35f   :  { %453 = vsyncpa [#allocation7], 1 }
 0x360   :  { %454 = vsyncpa [#allocation5], 1 }
 0x361   :  { %456 = vsyncpa [#allocation5 + $0x1], 1 }

</bundles_post_ra>
